<compile_context>
chip_gen: v5e
topology: v5e:2x2
jax: 0.10.0
libtpu: 0.0.40
codegen_flags: <defaults>
</compile_context>

<pallas_src>
import jax
import jax.numpy as jnp
from jax.experimental import pallas as pl
from jax.experimental.pallas import tpu as pltpu

EMB = 64      # self.emb_size
EPS = 1e-5    # torch.nn.LayerNorm default eps


# ----------------------------------------------------------------------------
# in-kernel helpers
# ----------------------------------------------------------------------------
def _layernorm(x, w, b):
    mu = jnp.mean(x, axis=-1, keepdims=True)
    var = jnp.mean(jnp.square(x - mu), axis=-1, keepdims=True)
    return (x - mu) * jax.lax.rsqrt(var + EPS) * w + b


def _bf16(x):
    return x.astype(jnp.bfloat16)


def _vmem_specs(n):
    return [pl.BlockSpec(memory_space=pltpu.MemorySpace.VMEM) for _ in range(n)]


_OUT_VMEM = pl.BlockSpec(memory_space=pltpu.MemorySpace.VMEM)


# ----------------------------------------------------------------------------
# Pallas kernels
# ----------------------------------------------------------------------------
def _node_embed_kernel(x_ref, lnw_ref, lnb_ref, w1_ref, b1_ref, w2_ref, b2_ref, o_ref):
    # Sequential(LayerNorm(F), Linear(F,E), ReLU, Linear(E,E), ReLU)
    x = _layernorm(x_ref[...], lnw_ref[...], lnb_ref[...])
    h = jnp.maximum(
        jnp.dot(_bf16(x), w1_ref[...], preferred_element_type=jnp.float32) + b1_ref[...], 0.0)
    h = jnp.maximum(
        jnp.dot(_bf16(h), w2_ref[...], preferred_element_type=jnp.float32) + b2_ref[...], 0.0)
    o_ref[...] = h


def _make_multi_matmul_kernel(has_bias):
    """Fused per-node pre-transforms: out_j = x_j @ w_j (+ b_j) for every job."""
    n_jobs = len(has_bias)

    def kernel(*refs):
        it = iter(refs)
        jobs = []
        for hb in has_bias:
            x = next(it)
            w = next(it)
            b = next(it) if hb else None
            jobs.append((x, w, b))
        outs = [next(it) for _ in range(n_jobs)]
        for (x, w, b), o in zip(jobs, outs):
            acc = jnp.dot(_bf16(x[...]), w[...], preferred_element_type=jnp.float32)
            if b is not None:
                acc = acc + b[...]
            o[...] = acc

    return kernel


def _make_step_kernel(num_src, with_head):
    """Fused: edge-LN + message MLP + bf16 scatter-add + LN(agg) + down-scale
    (+ optional sigmoid output head) for one target node type of one relation."""

    def kernel(*refs):
        it = iter(refs)
        x_t_ref = next(it)
        elnw_ref = next(it)
        elnb_ref = next(it)
        srcs = []
        for _ in range(num_src):
            srcs.append(dict(
                li=next(it), rj=next(it), ea=next(it), we=next(it),
                flnw=next(it), flnb=next(it), wf=next(it), bf=next(it),
                scat=next(it)))
        lnw_ref = next(it)
        lnb_ref = next(it)
        w1a_ref = next(it)
        w1b_ref = next(it)
        b1_ref = next(it)
        w2_ref = next(it)
        b2_ref = next(it)
        if with_head:
            hw1_ref = next(it)
            hb1_ref = next(it)
            hw2_ref = next(it)
        o_x_ref = next(it)
        o_head_ref = next(it) if with_head else None

        x = x_t_ref[...]
        agg = jnp.zeros_like(x)
        ew = elnw_ref[...]          # [1, 2]
        eb = elnb_ref[...]          # [1, 2]

        for s in srcs:
            # LayerNorm(2) on raw edge attrs -- explicit 2-column VPU form,
            # no lane-wasting XLU reduce.
            ea = s['ea'][...]                       # [Ne, 2]
            e0 = ea[:, 0:1]
            e1 = ea[:, 1:2]
            mu = (e0 + e1) * 0.5
            d0 = e0 - mu
            d1 = e1 - mu
            inv = jax.lax.rsqrt((d0 * d0 + d1 * d1) * 0.5 + EPS)
            n0 = d0 * inv * ew[:, 0:1] + eb[:, 0:1]
            n1 = d1 * inv * ew[:, 1:2] + eb[:, 1:2]
            # Linear(2, E, bias=False) as two VPU broadcast FMAs (no K=2 MXU dot).
            we = s['we'][...]                       # [2, E] f32
            edge_term = n0 * we[0:1, :] + n1 * we[1:2, :]   # [Ne, E]

            # message = final(LN, ReLU, Linear)( left(h_i) + edge(e) + right(h_j) )
            # left/right 64x64 transforms were hoisted to per-node (pretransform
            # kernel); li / rj are the gathered 64-wide results per edge.
            pre = s['li'][...] + s['rj'][...] + edge_term
            h = jnp.maximum(_layernorm(pre, s['flnw'][...], s['flnb'][...]), 0.0)
            msg = jnp.dot(_bf16(h), s['wf'][...],
                          preferred_element_type=jnp.float32) + s['bf'][...]
            # 'add' aggregation: bf16 one-hot scatter matrix, f32 accumulation.
            agg = agg + jnp.dot(s['scat'][...], _bf16(msg),
                                preferred_element_type=jnp.float32)

        # data[node].x = emb( cat([x, self.ln(agg)], -1) )
        aggn = _layernorm(agg, lnw_ref[...], lnb_ref[...])
        hid = jnp.maximum(
            jnp.dot(_bf16(x), w1a_ref[...], preferred_element_type=jnp.float32)
            + jnp.dot(_bf16(aggn), w1b_ref[...], preferred_element_type=jnp.float32)
            + b1_ref[...], 0.0)
        x_new = jnp.dot(_bf16(hid), w2_ref[...],
                        preferred_element_type=jnp.float32) + b2_ref[...]
        o_x_ref[...] = x_new

        if with_head:
            # output_module(x).sigmoid() fused into the final 'u' update.
            hh = jnp.maximum(
                jnp.dot(_bf16(x_new), hw1_ref[...],
                        preferred_element_type=jnp.float32) + hb1_ref[...], 0.0)
            logit = jnp.dot(_bf16(hh), hw2_ref[...], preferred_element_type=jnp.float32)
            o_head_ref[...] = jax.nn.sigmoid(logit)

    return kernel


def _output_kernel(x_ref, w1_ref, b1_ref, w2_ref, o_ref):
    # Standalone fallback head (only used if the head could not be fused).
    h = jnp.maximum(
        jnp.dot(_bf16(x_ref[...]), w1_ref[...],
                preferred_element_type=jnp.float32) + b1_ref[...], 0.0)
    o_ref[...] = jax.nn.sigmoid(
        jnp.dot(_bf16(h), w2_ref[...], preferred_element_type=jnp.float32))


# ----------------------------------------------------------------------------
# thin wrappers around pallas_call (whole-array blocks; everything fits VMEM)
# ----------------------------------------------------------------------------
def node_embed(x, p):
    n = x.shape[0]
    return pl.pallas_call(
        _node_embed_kernel,
        out_shape=jax.ShapeDtypeStruct((n, EMB), jnp.float32),
        in_specs=_vmem_specs(7), out_specs=_OUT_VMEM,
    )(x, p['lnw'], p['lnb'], p['w1'], p['b1'], p['w2'], p['b2'])


def multi_matmul(jobs):
    """jobs: list of (x [N,64] f32, w [64,K] bf16, b [1,K] f32 or None)."""
    has_bias = [b is not None for (_, _, b) in jobs]
    kernel = _make_multi_matmul_kernel(has_bias)
    args, out_shapes = [], []
    for x, w, b in jobs:
        args += [x, w] + ([b] if b is not None else [])
        out_shapes.append(jax.ShapeDtypeStruct((x.shape[0], w.shape[1]), jnp.float32))
    outs = pl.pallas_call(
        kernel,
        out_shape=tuple(out_shapes),
        in_specs=_vmem_specs(len(args)),
        out_specs=tuple(_vmem_specs(len(out_shapes))),
    )(*args)
    if not isinstance(outs, (tuple, list)):
        outs = (outs,)
    return list(outs)


def relation_step(x_t, per_src, eln_p, ln_p, emb_p, head_p=None):
    num_src = len(per_src)
    nt = x_t.shape[0]
    with_head = head_p is not None
    kernel = _make_step_kernel(num_src, with_head)
    args = [x_t, eln_p['lnw'], eln_p['lnb']]
    for s in per_src:
        args += [s['li'], s['rj'], s['ea'], s['we'], s['flnw'], s['flnb'],
                 s['wf'], s['bf'], s['scat']]
    args += [ln_p['lnw'], ln_p['lnb'],
             emb_p['w1a'], emb_p['w1b'], emb_p['b1'], emb_p['w2'], emb_p['b2']]
    if with_head:
        args += [head_p['w1'], head_p['b1'], head_p['w2']]
        out_shape = (jax.ShapeDtypeStruct((nt, EMB), jnp.float32),
                     jax.ShapeDtypeStruct((nt, 1), jnp.float32))
        out_specs = (_OUT_VMEM, _OUT_VMEM)
    else:
        out_shape = jax.ShapeDtypeStruct((nt, EMB), jnp.float32)
        out_specs = _OUT_VMEM
    return pl.pallas_call(
        kernel, out_shape=out_shape,
        in_specs=_vmem_specs(len(args)), out_specs=out_specs,
    )(*args)


def output_head(x, op):
    n = x.shape[0]
    return pl.pallas_call(
        _output_kernel,
        out_shape=jax.ShapeDtypeStruct((n, 1), jnp.float32),
        in_specs=_vmem_specs(4), out_specs=_OUT_VMEM,
    )(x, op['w1'], op['b1'], op['w2'])


# ----------------------------------------------------------------------------
# deterministic parameter init (synthetic; shapes follow the torch __init__)
# Matmul weights are pre-cast to bf16 (MXU operands); biases / LN params f32.
# ----------------------------------------------------------------------------
def _init_linear(key, fan_in, fan_out, bias=True, w_dtype=jnp.bfloat16):
    kw, kb = jax.random.split(key)
    bound = 1.0 / (fan_in ** 0.5)
    w = jax.random.uniform(kw, (fan_in, fan_out), jnp.float32, -bound, bound).astype(w_dtype)
    if not bias:
        return w
    b = jax.random.uniform(kb, (1, fan_out), jnp.float32, -bound, bound)
    return w, b


def _init_conv(key):
    ks = jax.random.split(key, 4)
    wl, bl = _init_linear(ks[0], EMB, EMB)                       # feature_module_left (bias)
    we = _init_linear(ks[1], 2, EMB, bias=False, w_dtype=jnp.float32)  # edge (VPU path)
    wr = _init_linear(ks[2], EMB, EMB, bias=False)               # feature_module_right
    wf, bf = _init_linear(ks[3], EMB, EMB)                       # feature_module_final Linear
    return dict(wl=wl, bl=bl, we=we, wr=wr,
                flnw=jnp.ones((1, EMB), jnp.float32),
                flnb=jnp.zeros((1, EMB), jnp.float32),
                wf=wf, bf=bf)


def _init_downscale(key):
    k1, k2 = jax.random.split(key)
    w1, b1 = _init_linear(k1, 2 * EMB, EMB)                      # Linear(2E, E)
    w2, b2 = _init_linear(k2, EMB, EMB)                          # Linear(E, E)
    return dict(w1a=w1[:EMB], w1b=w1[EMB:], b1=b1, w2=w2, b2=b2)


def init_params(key, var_nodes, con_nodes):
    keys = iter(jax.random.split(key, 1024))
    p = {}
    p['node_emb'] = []
    for f in (14, 6, 2):                                         # var / con / obj input dims
        w1, b1 = _init_linear(next(keys), f, EMB)
        w2, b2 = _init_linear(next(keys), EMB, EMB)
        p['node_emb'].append(dict(lnw=jnp.ones((1, f), jnp.float32),
                                  lnb=jnp.zeros((1, f), jnp.float32),
                                  w1=w1, b1=b1, w2=w2, b2=b2))
    p['edge_ln'] = dict(lnw=jnp.ones((1, 2), jnp.float32),
                        lnb=jnp.zeros((1, 2), jnp.float32))
    p['ln'] = dict(lnw=jnp.ones((1, EMB), jnp.float32),
                   lnb=jnp.zeros((1, EMB), jnp.float32))

    # (source, target) pairs that actually carry a BipartiteGraphConvolution
    pairs = []
    for v in var_nodes:
        pairs += [(v, 'obj'), ('obj', v)]
        for c in con_nodes:
            pairs += [(v, c), (c, v)]
    for c in con_nodes:
        pairs += [('obj', c), (c, 'obj')]

    all_types = var_nodes + con_nodes + ['obj']
    for rnd in ('round1', 'round2'):                             # con1/emb1 and con2/emb2
        conv = {pair: _init_conv(next(keys)) for pair in pairs}
        emb = {nt: _init_downscale(next(keys)) for nt in all_types}
        p[rnd] = dict(conv=conv, emb=emb)

    w1, b1 = _init_linear(next(keys), EMB, EMB)
    w2 = _init_linear(next(keys), EMB, 1, bias=False)
    p['out'] = dict(w1=w1, b1=b1, w2=w2)
    return p


# ----------------------------------------------------------------------------
# GNNPolicy.forward
# ----------------------------------------------------------------------------
def gnn_forward(params, node_feats, edges, raw_attr, var_nodes, con_nodes):
    # --- trans_dimensions: batched per parameter-sharing group ---
    x = {}
    var_cat = jnp.concatenate([node_feats[v] for v in var_nodes], axis=0)
    var_out = node_embed(var_cat, params['node_emb'][0])
    off = 0
    for v in var_nodes:
        n = node_feats[v].shape[0]
        x[v] = var_out[off:off + n]
        off += n
    con_cat = jnp.concatenate([node_feats[c] for c in con_nodes], axis=0)
    con_out = node_embed(con_cat, params['node_emb'][1])
    off = 0
    for c in con_nodes:
        n = node_feats[c].shape[0]
        x[c] = con_out[off:off + n]
        off += n
    x['obj'] = node_embed(node_feats['obj'], params['node_emb'][2])

    relations = ['v2o', 'o2c', 'v2c', 'c2o', 'o2v', 'c2v']
    targets = [['obj'], con_nodes, con_nodes, ['obj'], var_nodes, var_nodes]
    sources = [var_nodes, ['obj'], var_nodes, con_nodes, ['obj'], con_nodes]

    rounds = ('round1', 'round2')
    head_out = None
    for ri, rnd in enumerate(rounds):
        conv_p = params[rnd]['conv']
        emb_p = params[rnd]['emb']
        for tars, sous, rel in zip(targets, sources, relations):
            srcs_of = {t: [s for s in sous if (s, rel, t) in edges] for t in tars}
            tgts_of = {s: [t for t in tars if (s, rel, t) in edges] for s in sous}

            # --- per-node pre-transforms (wl/wr hoisted out of the per-edge path);
            #     weights concatenated so matmul outputs are 128-lane dense. ---
            jobs, job_keys = [], []
            for t in tars:
                ss = srcs_of[t]
                if ss:
                    wl_cat = jnp.concatenate([conv_p[(s, t)]['wl'] for s in ss], axis=1)
                    bl_cat = jnp.concatenate([conv_p[(s, t)]['bl'] for s in ss], axis=1)
                    jobs.append((x[t], wl_cat, bl_cat))
                    job_keys.append(('L', t))
            for s in sous:
                ts = tgts_of[s]
                if ts:
                    wr_cat = jnp.concatenate([conv_p[(s, t)]['wr'] for t in ts], axis=1)
                    jobs.append((x[s], wr_cat, None))
                    job_keys.append(('R', s))
            pre = dict(zip(job_keys, multi_matmul(jobs))) if jobs else {}

            # --- fused conv + scatter-add + LN + down-scale per target node type ---
            new_x = {}
            for t in tars:
                nt = x[t].shape[0]
                per_src = []
                for si, s in enumerate(srcs_of[t]):
                    ei, akey = edges[(s, rel, t)]
                    src_idx, tgt_idx = ei[0], ei[1]
                    L = pre[('L', t)][:, si * EMB:(si + 1) * EMB]
                    ti = tgts_of[s].index(t)
                    R = pre[('R', s)][:, ti * EMB:(ti + 1) * EMB]
                    # TODO(synk): at large Ne, move these gathers and the scatter
                    # in-kernel (PrefetchScalarGridSpec + pl.Element / tiled scatter).
                    li = L[tgt_idx]
                    rj = R[src_idx]
                    scat = jax.nn.one_hot(tgt_idx, nt, dtype=jnp.bfloat16).T  # [Nt, Ne]
                    cp = conv_p[(s, t)]
                    per_src.append(dict(li=li, rj=rj, ea=raw_attr[akey], scat=scat,
                                        we=cp['we'], flnw=cp['flnw'], flnb=cp['flnb'],
                                        wf=cp['wf'], bf=cp['bf']))
                is_final_u = (ri == len(rounds) - 1 and rel == relations[-1] and t == 'u')
                head_p = params['out'] if is_final_u else None
                res = relation_step(x[t], per_src, params['edge_ln'], params['ln'],
                                    emb_p[t], head_p)
                if is_final_u:
                    new_x[t], head_out = res
                else:
                    new_x[t] = res
            x.update(new_x)

    if head_out is None:                       # fallback if the head was not fused
        head_out = output_head(x['u'], params['out'])
    return head_out


# ----------------------------------------------------------------------------
# main
# ----------------------------------------------------------------------------
if __name__ == "__main__":
    key = jax.random.PRNGKey(0)
    keys = iter(jax.random.split(key, 512))

    # small synthetic heterogeneous graph (trans_dimensions filters to present types)
    var_nodes = ['u', 'p']
    con_nodes = ['Unit_generation_limits', 'Power_balance_constrains']
    n_nodes = {'u': 8, 'p': 8,
               'Unit_generation_limits': 8, 'Power_balance_constrains': 8,
               'obj': 4}
    f_in = {'u': 14, 'p': 14,
            'Unit_generation_limits': 6, 'Power_balance_constrains': 6,
            'obj': 2}
    n_edges = 16

    node_feats = {nt: jax.random.normal(next(keys), (n_nodes[nt], f_in[nt]), jnp.float32)
                  for nt in var_nodes + con_nodes + ['obj']}

    edges = {}       # (src, rel, tgt) -> (edge_index [2,Ne], canonical attr key)
    raw_attr = {}    # canonical (forward) key -> raw edge_attr [Ne, 2]

    def add_edge_pair(src, fwd_rel, tgt, rev_rel):
        k1, k2, k3 = jax.random.split(next(keys), 3)
        si = jax.random.randint(k1, (n_edges,), 0, n_nodes[src], jnp.int32)
        ti = jax.random.randint(k2, (n_edges,), 0, n_nodes[tgt], jnp.int32)
        attr = jax.random.normal(k3, (n_edges, 2), jnp.float32)
        fkey = (src, fwd_rel, tgt)
        rkey = (tgt, rev_rel, src)
        edges[fkey] = (jnp.stack([si, ti]), fkey)
        edges[rkey] = (jnp.stack([ti, si]), fkey)      # reverse relation shares attr
        raw_attr[fkey] = attr

    for v in var_nodes:
        for c in con_nodes:
            add_edge_pair(v, 'v2c', c, 'c2v')
    for c in con_nodes:
        add_edge_pair('obj', 'o2c', c, 'c2o')
    for v in var_nodes:
        add_edge_pair('obj', 'o2v', v, 'v2o')

    params = init_params(next(keys), var_nodes, con_nodes)

    out = gnn_forward(params, node_feats, edges, raw_attr, var_nodes, con_nodes)
    out = jax.block_until_ready(out)
    assert out.shape == (n_nodes['u'], 1)
    assert bool(jnp.all(jnp.isfinite(out)))
    print("KERNEL_OK")
</pallas_src>

<mosaic_0001>
module attributes {stable_mosaic.version = 11 : i64} {
  func.func @_node_embed_kernel(%arg0: memref<16x14xf32, #tpu.memory_space<vmem>>, %arg1: memref<1x14xf32, #tpu.memory_space<vmem>>, %arg2: memref<1x14xf32, #tpu.memory_space<vmem>>, %arg3: memref<14x64xbf16, #tpu.memory_space<vmem>>, %arg4: memref<1x64xf32, #tpu.memory_space<vmem>>, %arg5: memref<64x64xbf16, #tpu.memory_space<vmem>>, %arg6: memref<1x64xf32, #tpu.memory_space<vmem>>, %arg7: memref<16x64xf32, #tpu.memory_space<vmem>>) attributes {dimension_semantics = [], scalar_prefetch = 0 : i64, scratch_operands = 0 : i64, tpu.core_type = #tpu.core_type<tc>} {
    %c0 = arith.constant 0 : index
    %c0_0 = arith.constant 0 : index
    %0 = vector.load %arg0[%c0, %c0_0] : memref<16x14xf32, #tpu.memory_space<vmem>>, vector<16x14xf32>
    %c0_1 = arith.constant 0 : index
    %c0_2 = arith.constant 0 : index
    %1 = vector.load %arg1[%c0_1, %c0_2] : memref<1x14xf32, #tpu.memory_space<vmem>>, vector<1x14xf32>
    %c0_3 = arith.constant 0 : index
    %c0_4 = arith.constant 0 : index
    %2 = vector.load %arg2[%c0_3, %c0_4] : memref<1x14xf32, #tpu.memory_space<vmem>>, vector<1x14xf32>
    %cst = arith.constant dense<0.000000e+00> : vector<16xf32>
    %3 = vector.multi_reduction <add>, %0, %cst [1] : vector<16x14xf32> to vector<16xf32>
    %4 = vector.shape_cast %3 : vector<16xf32> to vector<16x1xf32>
    %cst_5 = arith.constant 1.400000e+01 : f32
    %5 = vector.broadcast %cst_5 : f32 to vector<16x1xf32>
    %6 = arith.divf %4, %5 : vector<16x1xf32>
    %7 = vector.broadcast %6 : vector<16x1xf32> to vector<16x14xf32>
    %8 = arith.subf %0, %7 : vector<16x14xf32>
    %9 = arith.mulf %8, %8 : vector<16x14xf32>
    %cst_6 = arith.constant dense<0.000000e+00> : vector<16xf32>
    %10 = vector.multi_reduction <add>, %9, %cst_6 [1] : vector<16x14xf32> to vector<16xf32>
    %11 = vector.shape_cast %10 : vector<16xf32> to vector<16x1xf32>
    %cst_7 = arith.constant 1.400000e+01 : f32
    %12 = vector.broadcast %cst_7 : f32 to vector<16x1xf32>
    %13 = arith.divf %11, %12 : vector<16x1xf32>
    %14 = vector.broadcast %6 : vector<16x1xf32> to vector<16x14xf32>
    %15 = arith.subf %0, %14 : vector<16x14xf32>
    %cst_8 = arith.constant 9.99999974E-6 : f32
    %16 = vector.broadcast %cst_8 : f32 to vector<16x1xf32>
    %17 = arith.addf %13, %16 : vector<16x1xf32>
    %18 = math.rsqrt %17 : vector<16x1xf32>
    %19 = vector.broadcast %18 : vector<16x1xf32> to vector<16x14xf32>
    %20 = arith.mulf %15, %19 : vector<16x14xf32>
    %21 = vector.broadcast %1 : vector<1x14xf32> to vector<16x14xf32>
    %22 = arith.mulf %20, %21 : vector<16x14xf32>
    %23 = vector.broadcast %2 : vector<1x14xf32> to vector<16x14xf32>
    %24 = arith.addf %22, %23 : vector<16x14xf32>
    %25 = arith.truncf %24 : vector<16x14xf32> to vector<16x14xbf16>
    %c0_9 = arith.constant 0 : index
    %c0_10 = arith.constant 0 : index
    %26 = vector.load %arg3[%c0_9, %c0_10] : memref<14x64xbf16, #tpu.memory_space<vmem>>, vector<14x64xbf16>
    %cst_11 = arith.constant dense<0.000000e+00> : vector<16x64xf32>
    %27 = tpu.matmul %25, %26, %cst_11 {dimension_numbers = #tpu.dot_dimension_numbers<[1], [0], [0], [1], [0, 0, 1, 1], [], []>} : vector<16x14xbf16>, vector<14x64xbf16>, vector<16x64xf32> -> vector<16x64xf32>
    %c0_12 = arith.constant 0 : index
    %c0_13 = arith.constant 0 : index
    %28 = vector.load %arg4[%c0_12, %c0_13] : memref<1x64xf32, #tpu.memory_space<vmem>>, vector<1x64xf32>
    %29 = vector.broadcast %28 : vector<1x64xf32> to vector<16x64xf32>
    %30 = arith.addf %27, %29 : vector<16x64xf32>
    %cst_14 = arith.constant 0.000000e+00 : f32
    %31 = vector.broadcast %cst_14 : f32 to vector<16x64xf32>
    %32 = arith.maximumf %30, %31 : vector<16x64xf32>
    %33 = arith.truncf %32 : vector<16x64xf32> to vector<16x64xbf16>
    %c0_15 = arith.constant 0 : index
    %c0_16 = arith.constant 0 : index
    %34 = vector.load %arg5[%c0_15, %c0_16] : memref<64x64xbf16, #tpu.memory_space<vmem>>, vector<64x64xbf16>
    %cst_17 = arith.constant dense<0.000000e+00> : vector<16x64xf32>
    %35 = tpu.matmul %33, %34, %cst_17 {dimension_numbers = #tpu.dot_dimension_numbers<[1], [0], [0], [1], [0, 0, 1, 1], [], []>} : vector<16x64xbf16>, vector<64x64xbf16>, vector<16x64xf32> -> vector<16x64xf32>
    %c0_18 = arith.constant 0 : index
    %c0_19 = arith.constant 0 : index
    %36 = vector.load %arg6[%c0_18, %c0_19] : memref<1x64xf32, #tpu.memory_space<vmem>>, vector<1x64xf32>
    %37 = vector.broadcast %36 : vector<1x64xf32> to vector<16x64xf32>
    %38 = arith.addf %35, %37 : vector<16x64xf32>
    %cst_20 = arith.constant 0.000000e+00 : f32
    %39 = vector.broadcast %cst_20 : f32 to vector<16x64xf32>
    %40 = arith.maximumf %38, %39 : vector<16x64xf32>
    %c0_21 = arith.constant 0 : index
    %c0_22 = arith.constant 0 : index
    %41 = vector.load %arg7[%c0_21, %c0_22] : memref<16x64xf32, #tpu.memory_space<vmem>>, vector<16x64xf32>
    tpu.vector_store %arg7[%c0_21, %c0_22], %40 {strides = array<i32>} : memref<16x64xf32, #tpu.memory_space<vmem>>, vector<16x64xf32>,
    return
  }
}

</mosaic_0001>

<bundles_post_ra>
// kernel: tpu_custom_call.1
= control target key start
LH: loop header
LB: loop body
LE: loop exit
PB: predicated region body
PF: predicated region fallthrough
CT: control target
= control target key end

     0   :  { %12 = vsyncpa [#allocation3], 0  ;;  %s533_s0 = inlined_call_operand.hbm [shape: f32[16,14], index: 0, kind: input, shape index: {}]   ;;  %s534_s1 = inlined_call_operand.hbm [shape: f32[1,14], index: 1, kind: input, shape index: {}]   ;;  %s535_s2 = inlined_call_operand.vmem [shape: f32[1,14], index: 2, kind: input, shape index: {}]   ;;  %s536_s3 = inlined_call_operand.hbm [shape: bf16[14,64], index: 3, kind: input, shape index: {}]   ;;  %s537_s4 = inlined_call_operand.vmem [shape: f32[1,64], index: 4, kind: input, shape index: {}]   ;;  %s538_s5 = inlined_call_operand.hbm [shape: bf16[64,64], index: 5, kind: input, shape index: {}]   ;;  %s539_s6 = inlined_call_operand.vmem [shape: f32[1,64], index: 6, kind: input, shape index: {}]   ;;  %s540_s7 = inlined_call_operand.hbm [shape: f32[16,64], index: 7, kind: output, shape index: {}]  }
   0x1   :  { %13 = vsyncpa [#allocation6], 0 }
   0x2   :  { %14 = vsyncpa [#allocation9], 0  ;;  %s34_s26 = sshll.u32 %s534_s1, 4  ;;  %s35_s26 = int_to_ptr.hbm [resolvable:$true] %s34_s26 }
   0x3   :  { %15 = vsyncpa [#allocation4], 0  ;;  %s445_s27 = smov [#allocation5]   ;;  %s20_s8 = sshll.u32 %s533_s0, 4  ;;  %s21_s8 = int_to_ptr.hbm [resolvable:$true] %s20_s8 }
   0x4   :  { %s36_s28 = sshll.u32 %s445_s27, 4  ;;  %s446_s9 = smov [#allocation2]   ;;  %s37_s28 = int_to_ptr.vmem [resolvable:$true] %s36_s28 }
   0x5   :  { %39 = dma.hbm_to_vmem [thread:$0]  %s35_s26, 16, %s37_s28, [#allocation6]  }
   0x6   :  { %s22_s10 = sshll.u32 %s446_s9, 4  ;;  %s447_s11 = smov 128   ;;  %s23_s10 = int_to_ptr.vmem [resolvable:$true] %s22_s10 }
   0x7   :  { %s448_s12 = smov 8   ;;  %s46_s14 = sshll.u32 %s536_s3, 4  ;;  %s47_s14 = int_to_ptr.hbm [resolvable:$true] %s46_s14 }
   0x8   :  { %28 = dma.hbm_to_vmem [thread:$0]  %s21_s8, 256, %s23_s10, [#allocation3], %s447_s11, %s447_s11, %s448_s12  }
   0x9   :  { %s449_s15 = smov [#allocation7]   ;;  %s61_s18 = sshll.u32 %s538_s5, 4  ;;  %s62_s18 = int_to_ptr.hbm [resolvable:$true] %s61_s18 }
   0xa   :  { %s48_s16 = sshll.u32 %s449_s15, 4  ;;  %s450_s19 = smov 64   ;;  %s49_s16 = int_to_ptr.vmem [resolvable:$true] %s48_s16 }
   0xb   :  { %s451_s20 = smov 4   ;;  %s452_s21 = smov [#allocation8]  }
   0xc   :  { %54 = dma.hbm_to_vmem [thread:$0]  %s47_s14, 128, %s49_s16, [#allocation6], %s450_s19, %s450_s19, %s451_s20  }
   0xd   :  { %s63_s22 = sshll.u32 %s452_s21, 4  ;;  %s64_s22 = int_to_ptr.vmem [resolvable:$true] %s63_s22 }
   0xe   :  { %69 = dma.hbm_to_vmem [thread:$0]  %s62_s18, 512, %s64_s22, [#allocation9], %s450_s19, %s450_s19, %s451_s20  }
   0xf   :  { %437 = dma.done.wait [#allocation3], 256  }
  0x10   :  { %438 = vsyncadd [#allocation3], 4294967040 }
  0x11   :  { %439 = dma.done.wait [#allocation6], 144  }
  0x12   :  { %440 = vsyncadd [#allocation6], 4294967152 }
  0x13   :  { %441 = dma.done.wait [#allocation9], 512  }
  0x14   :  { %442 = vsyncadd [#allocation9], 4294966784  ;;  %vm93_vm0 = vcmask 113664   ;;  %v89_v0 = vld [vmem:[#allocation2] sm:$0xff]  ;;  %v90_v2 = vld [vmem:[#allocation2 + $0x8] sm:$0xff]  ;;  %v453_v4 = vmov 14.0  }
  0x15   :  { %v94_v1 = vsel %vm93_vm0, %v89_v0, 0.0  ;;  %v97_v3 = vsel %vm93_vm0, %v90_v2, 0.0  ;;  %311 = vrcp.f32 %v453_v4  ;;  %v272_v21 = vld [vmem:[#allocation7] sm:$0xf]  ;;  %v292_v22 = vld [vmem:[#allocation7] sm:$0x70] }
  0x16   :  { %95 = vadd.xlane.f32.xlu0 %v94_v1  ;;  %vm170_vm2 = vcmask 1046528   ;;  %v273_v24 = vor.u32 %v292_v22, %v272_v21  ;;  %v307_v44 = vld [vmem:[#allocation5] ss:$0 sm:$0xff]  ;;  %v308_v49 = vld [vmem:[%s535_s2] ss:$0 sm:$0xff]  ;;  %v296_v54 = vld [vmem:[#allocation8 + $0x18] sm:$0xff] }
  0x17   :  { %235 = vmatpush.bf16.msra.mxu1 %v296_v54  ;;  %v295_v55 = vld [vmem:[#allocation8 + $0x10] sm:$0xff]  ;;  %v294_v56 = vld [vmem:[#allocation8 + $0x8] sm:$0xff]  ;;  %v293_v57 = vld [vmem:[#allocation8] sm:$0xff]  ;;  %vm227_vm9 = vcmask 523264   ;;  %s255_s29 = sshll.u32 %s540_s7, 4  ;;  %s256_s29 = int_to_ptr.hbm [resolvable:$true] %s255_s29 }
  0x18   :  { %v172_v26 = vsel %vm170_vm2, %v273_v24, 0  ;;  %v309_v59 = vld [vmem:[%s537_s4] ss:$0 sm:$0xff]  ;;  %s454_s4 = smov [#allocation10]  }
  0x19   :  { %181 = vmatpush.bf16.msra.mxu0 %v172_v26  ;;  %s253_s26 = sshll.u32 %s454_s4, 4  ;;  %s254_s26 = int_to_ptr.vmem [resolvable:$true] %s253_s26 }
  0x1b   :  { %v312_v5 = vpop.eup %311  ;;  %236 = vmatpush.bf16.msra.mxu1 %v295_v55 }
  0x1c   :  { %v101_v6 = vmul.f32 14.0, %v312_v5  ;;  %vm105_vm1 = vweird.f32 %v312_v5 }
  0x1e   :  { %98 = vadd.xlane.f32.xlu0 %v97_v3  ;;  %v102_v7 = vsub.f32 1.0, %v101_v6 }
  0x1f   :  { %237 = vmatpush.bf16.msra.mxu1 %v294_v56 }
  0x20   :  { %v103_v8 = vmul.f32 %v312_v5, %v102_v7 }
  0x22   :  { %v104_v9 = vadd.f32 %v312_v5, %v103_v8 }
  0x23   :  { %238 = vmatpush.bf16.msra.mxu1 %v293_v57 }
  0x24   :  { %v106_v10 = vsel %vm105_vm1, %v312_v5, %v104_v9 }
  0x89   :  { %v96_v11 = vpop.xlane.xlu0 %95 }
  0x8a   :  { %v107_v12 = vmul.f32 %v106_v10, %v96_v11 }
  0x8c   :  { %v109_v13 = vsub.f32 %v89_v0, %v107_v12 }
  0x8e   :  { %v111_v14 = vmul.f32 %v109_v13, %v109_v13 }
  0x90   :  { %v113_v15 = vsel %vm93_vm0, %v111_v14, 0.0 }
  0x91   :  { %114 = vadd.xlane.f32.xlu1 %v113_v15  ;;  %v99_v16 = vpop.xlane.xlu0 %98 }
  0x92   :  { %v108_v17 = vmul.f32 %v106_v10, %v99_v16 }
  0x94   :  { %v110_v18 = vsub.f32 %v90_v2, %v108_v17  ;;  %v310_v2 = vld [vmem:[%s539_s6] ss:$0 sm:$0xff] }
  0x96   :  { %v112_v19 = vmul.f32 %v110_v18, %v110_v18 }
  0x98   :  { %v116_v20 = vsel %vm93_vm0, %v112_v19, 0.0 }
  0x99   :  { %117 = vadd.xlane.f32.xlu1 %v116_v20 }
 0x104   :  { %v115_v23 = vpop.xlane.xlu1 %114 }
 0x105   :  { %v119_v25 = vmul.f32 %v115_v23, %v106_v10 }
 0x107   :  { %v121_v27 = vadd.f32 1e-05, %v119_v25 }
 0x109   :  { %313 = vrsqrt.f32 %v121_v27  ;;  %vm129_vm4 = vweird.f32 %v121_v27 }
 0x10c   :  { %v118_v28 = vpop.xlane.xlu1 %117 }
 0x10d   :  { %v120_v29 = vmul.f32 %v118_v28, %v106_v10 }
 0x10f   :  { %v314_v30 = vpop.eup %313  ;;  %v122_v31 = vadd.f32 1e-05, %v120_v29 }
 0x110   :  { %v124_v32 = vmul.f32 %v314_v30, %v121_v27  ;;  %vm130_vm3 = vweird.f32 %v314_v30 }
 0x111   :  { %315 = vrsqrt.f32 %v122_v31  ;;  %vm131_vm5 = vmor %vm129_vm4, %vm130_vm3  ;;  %vm139_vm7 = vweird.f32 %v122_v31 }
 0x112   :  { %v125_v33 = vmul.f32 %v314_v30, %v124_v32 }
 0x114   :  { %v126_v34 = vmul.f32 0.5, %v125_v33 }
 0x116   :  { %v127_v35 = vsub.f32 1.5, %v126_v34 }
 0x117   :  { %v316_v36 = vpop.eup %315 }
 0x118   :  { %v128_v37 = vmul.f32 %v314_v30, %v127_v35  ;;  %v134_v38 = vmul.f32 %v316_v36, %v122_v31  ;;  %vm140_vm6 = vweird.f32 %v316_v36 }
 0x119   :  { %vm141_vm8 = vmor %vm139_vm7, %vm140_vm6 }
 0x11a   :  { %v135_v39 = vmul.f32 %v316_v36, %v134_v38  ;;  %v132_v40 = vsel %vm131_vm5, %v314_v30, %v128_v37 }
 0x11b   :  { %v143_v43 = vmul.f32 %v132_v40, %v109_v13 }
 0x11c   :  { %v136_v41 = vmul.f32 0.5, %v135_v39 }
 0x11d   :  { %v148_v48 = vmul.f32 %v307_v44, %v143_v43 }
 0x11e   :  { %v137_v42 = vsub.f32 1.5, %v136_v41 }
 0x11f   :  { %v153_v51 = vadd.f32 %v308_v49, %v148_v48 }
 0x120   :  { %v138_v45 = vmul.f32 %v316_v36, %v137_v42 }
 0x122   :  { %v142_v46 = vsel %vm141_vm8, %v316_v36, %v138_v45 }
 0x123   :  { %v144_v47 = vmul.f32 %v142_v46, %v110_v18 }
 0x125   :  { %v149_v50 = vmul.f32 %v307_v44, %v144_v47 }
 0x127   :  { %v154_v52 = vadd.f32 %v308_v49, %v149_v50 }
 0x129   :  { %v155_v53 = vpack.c.bf16 %v154_v52, %v153_v51 }
 0x12b   :  { %274 = vmatmul.msk.bf16.vlgmr.msra.gmra.mxu0 %vm93_vm0, %v155_v53 }
 0x1a8   :  { %v183_v58 = vpop.f32.mrf.mxu0 }
 0x1a9   :  { %v184_v60 = vadd.f32 %v309_v59, %v183_v58 }
 0x1ab   :  { %v188_v63 = vmax.f32 %v184_v60, 0.0 }
 0x1b0   :  { %v185_v61 = vpop.f32.mrf.mxu0 }
 0x1b1   :  { %v186_v62 = vadd.f32 %v309_v59, %v185_v61 }
 0x1b3   :  { %v189_v0 = vmax.f32 %v186_v62, 0.0 }
 0x1b5   :  { %v190_v1 = vpack.c.bf16 %v189_v0, %v188_v63 }
 0x1b7   :  { %291 = vmatmul.msk.bf16.vlgmr.msra.gmra.mxu1 %vm227_vm9, %v190_v1 }
 0x234   :  { %v240_v3 = vpop.f32.mrf.mxu1 }
 0x235   :  { %v241_v4 = vadd.f32 %v310_v2, %v240_v3 }
 0x237   :  { %v245_v5 = vmax.f32 %v241_v4, 0.0 }
 0x239   :  { %247 = vst.msk [vmem:[#allocation10] sm:$0xff] %vm227_vm9, %v245_v5 }
 0x23c   :  { %v242_v6 = vpop.f32.mrf.mxu1 }
 0x23d   :  { %v243_v7 = vadd.f32 %v310_v2, %v242_v6 }
 0x23f   :  { %v246_v8 = vmax.f32 %v243_v7, 0.0 }
 0x241   :  { %248 = vst.msk [vmem:[#allocation10 + $0x8] sm:$0xff] %vm227_vm9, %v246_v8 }
 0x242   :  { %261 = dma.vmem_to_hbm [thread:$0]  %s254_s26, 256, %s256_s29, [#allocation4], %s447_s11, %s447_s11, %s448_s12  }
 0x243   :  { %443 = dma.done.wait [#allocation4], 256  }
 0x244   :  { %444 = vsyncadd [#allocation4], 4294967040 }
 0x245   :  { %266 = vsyncpa [#allocation3], 1 }
 0x246   :  { %267 = vsyncpa [#allocation6], 1 }
 0x247   :  { %268 = vsyncpa [#allocation9], 1 }
 0x248   :  { %269 = vsyncpa [#allocation4], 1 }

</bundles_post_ra>
